<compile_context>
chip_gen: v7x
topology: tpu7x:2x2x1
jax: 0.10.0
libtpu: 0.0.40
codegen_flags: <defaults>
</compile_context>

<pallas_src>
import functools

import jax
import jax.numpy as jnp
from jax.experimental import pallas as pl
from jax.experimental.pallas import tpu as pltpu

BN_EPS = 1e-5


def _round_up(n, m):
    return ((n + m - 1) // m) * m


def class_block_kernel(x_ref, w1_ref, b1_ref, gamma_ref, beta_ref,
                       mean_ref, var_ref, w2_ref, b2_ref,
                       logits_ref, f_ref, *, relu):
    # ---- add_block: Linear(input_dim -> num_bottleneck), bf16 MXU / f32 acc ----
    h = jnp.dot(x_ref[...], w1_ref[...], preferred_element_type=jnp.float32)

    # ---- add_block: BatchNorm1d (eval, running stats) folded into one affine ----
    inv_std = jax.lax.rsqrt(var_ref[...] + BN_EPS)                 # (1, Nb), EUP
    scale = gamma_ref[...] * inv_std                               # (1, Nb)
    shift = (b1_ref[...] - mean_ref[...]) * scale + beta_ref[...]  # (1, Nb)
    bn = h * scale + shift                                         # (TB, Nb), f32

    if relu:  # LeakyReLU(0.1); module default is relu=False
        bn = jnp.where(bn >= 0.0, bn, 0.1 * bn)

    # Dropout is identity in eval mode.
    # TODO(synk): train-mode BatchNorm (batch statistics) and stochastic Dropout
    # are not reproduced; this kernel implements the deterministic eval forward.

    # ---- return_f branch: f is the bottleneck feature after add_block ----
    f_ref[...] = bn.astype(f_ref.dtype)

    # ---- classifier: Linear(num_bottleneck -> class_num), bf16 MXU / f32 acc ----
    logits = jnp.dot(bn.astype(w2_ref.dtype), w2_ref[...],
                     preferred_element_type=jnp.float32) + b2_ref[...]
    logits_ref[...] = logits.astype(logits_ref.dtype)


def class_block_pcb(x, w1, b1, gamma, beta, running_mean, running_var, w2, b2,
                    *, relu=False, block_b=256):
    """Eval-mode forward of ClassBlock_PCB (return_f=True): returns (logits, f)."""
    B, input_dim = x.shape
    num_bottleneck = w1.shape[1]
    class_num = w2.shape[1]

    # Pad feature dims to lane width (128) and batch to the tile size.
    Dp = _round_up(input_dim, 128)
    Nbp = _round_up(num_bottleneck, 128)
    Cp = _round_up(class_num, 128)
    TB = min(block_b, _round_up(B, 8))
    Bp = _round_up(B, TB)

    f32, bf16 = jnp.float32, jnp.bfloat16

    def pad2(a, rows, cols, dtype, fill=0.0):
        a = a.astype(dtype)
        return jnp.pad(a, ((0, rows - a.shape[0]), (0, cols - a.shape[1])),
                       constant_values=fill)

    x_p = pad2(x, Bp, Dp, bf16)
    w1_p = pad2(w1, Dp, Nbp, bf16)
    w2_p = pad2(w2, Nbp, Cp, bf16)
    b1_p = pad2(b1.reshape(1, -1), 1, Nbp, f32)
    gamma_p = pad2(gamma.reshape(1, -1), 1, Nbp, f32)
    beta_p = pad2(beta.reshape(1, -1), 1, Nbp, f32)
    mean_p = pad2(running_mean.reshape(1, -1), 1, Nbp, f32)
    var_p = pad2(running_var.reshape(1, -1), 1, Nbp, f32, fill=1.0)
    b2_p = pad2(b2.reshape(1, -1), 1, Cp, f32)

    # VMEM budget: resident weights + double-buffered streamed x / outputs.
    resident = (Dp * Nbp + Nbp * Cp) * 2 + 5 * Nbp * 4 + Cp * 4
    streamed = 2 * TB * (Dp * 2 + Nbp * 4 + Cp * 4)
    vmem_limit = int(min(60 << 20, max(32 << 20, 2 * (resident + streamed))))

    row_spec = lambda cols: pl.BlockSpec((1, cols), lambda i: (0, 0))

    out_shape = (
        jax.ShapeDtypeStruct((Bp, Cp), f32),    # logits
        jax.ShapeDtypeStruct((Bp, Nbp), f32),   # bottleneck feature f
    )

    # TODO(synk): for input_dim >~ 4K add a K-reduction grid axis ("arbitrary")
    # with an f32 accumulator instead of keeping the whole w1 block resident.
    logits_p, f_p = pl.pallas_call(
        functools.partial(class_block_kernel, relu=relu),
        out_shape=out_shape,
        grid=(Bp // TB,),
        in_specs=[
            pl.BlockSpec((TB, Dp), lambda i: (i, 0)),     # x tile (streamed)
            pl.BlockSpec((Dp, Nbp), lambda i: (0, 0)),    # w1 (VMEM-resident)
            row_spec(Nbp),                                # b1
            row_spec(Nbp),                                # gamma
            row_spec(Nbp),                                # beta
            row_spec(Nbp),                                # running_mean
            row_spec(Nbp),                                # running_var
            pl.BlockSpec((Nbp, Cp), lambda i: (0, 0)),    # w2 (VMEM-resident)
            row_spec(Cp),                                 # b2
        ],
        out_specs=(
            pl.BlockSpec((TB, Cp), lambda i: (i, 0)),     # logits tile
            pl.BlockSpec((TB, Nbp), lambda i: (i, 0)),    # f tile
        ),
        compiler_params=pltpu.CompilerParams(
            dimension_semantics=("parallel",),
            vmem_limit_bytes=vmem_limit,
        ),
    )(x_p, w1_p, b1_p, gamma_p, beta_p, mean_p, var_p, w2_p, b2_p)

    return logits_p[:B, :class_num], f_p[:B, :num_bottleneck]


def init_params(key, input_dim, num_bottleneck, class_num):
    k1, k2, k3 = jax.random.split(key, 3)
    # Linear1: kaiming_normal_(a=0, mode='fan_out') -> std = sqrt(2 / num_bottleneck)
    w1 = jax.random.normal(k1, (input_dim, num_bottleneck), jnp.float32) \
         * jnp.sqrt(2.0 / num_bottleneck)
    b1 = jnp.zeros((num_bottleneck,), jnp.float32)
    # BatchNorm1d: weight ~ N(1, 0.02), bias = 0, fresh running stats (0, 1)
    gamma = 1.0 + 0.02 * jax.random.normal(k2, (num_bottleneck,), jnp.float32)
    beta = jnp.zeros((num_bottleneck,), jnp.float32)
    running_mean = jnp.zeros((num_bottleneck,), jnp.float32)
    running_var = jnp.ones((num_bottleneck,), jnp.float32)
    # classifier Linear: weight ~ N(0, 0.001), bias = 0
    w2 = 0.001 * jax.random.normal(k3, (num_bottleneck, class_num), jnp.float32)
    b2 = jnp.zeros((class_num,), jnp.float32)
    return w1, b1, gamma, beta, running_mean, running_var, w2, b2


def reference(x, w1, b1, gamma, beta, running_mean, running_var, w2, b2):
    # Mirrors the kernel numerics: bf16 MXU inputs, f32 accumulate / elementwise.
    h = jnp.dot(x.astype(jnp.bfloat16), w1.astype(jnp.bfloat16),
                preferred_element_type=jnp.float32) + b1
    bn = gamma * (h - running_mean) / jnp.sqrt(running_var + BN_EPS) + beta
    f = bn
    logits = jnp.dot(bn.astype(jnp.bfloat16), w2.astype(jnp.bfloat16),
                     preferred_element_type=jnp.float32) + b2
    return logits, f


if __name__ == "__main__":
    B, input_dim, num_bottleneck, class_num = 8, 32, 128, 16

    key = jax.random.PRNGKey(0)
    kx, kp = jax.random.split(key)
    x = jax.random.normal(kx, (B, input_dim), jnp.float32)
    params = init_params(kp, input_dim, num_bottleneck, class_num)

    logits, f = class_block_pcb(x, *params)
    jax.block_until_ready((logits, f))

    ref_logits, ref_f = reference(x, *params)
    assert logits.shape == (B, class_num) and f.shape == (B, num_bottleneck)
    assert jnp.allclose(f, ref_f, atol=1e-4, rtol=1e-4), \
        float(jnp.max(jnp.abs(f - ref_f)))
    assert jnp.allclose(logits, ref_logits, atol=1e-4, rtol=1e-4), \
        float(jnp.max(jnp.abs(logits - ref_logits)))

    print("KERNEL_OK")
</pallas_src>

<mosaic_0001>
module attributes {stable_mosaic.version = 11 : i64} {
  func.func @class_block_kernel(%arg0: i32, %arg1: memref<8x128xbf16, #tpu.memory_space<vmem>>, %arg2: memref<128x128xbf16, #tpu.memory_space<vmem>>, %arg3: memref<1x128xf32, #tpu.memory_space<vmem>>, %arg4: memref<1x128xf32, #tpu.memory_space<vmem>>, %arg5: memref<1x128xf32, #tpu.memory_space<vmem>>, %arg6: memref<1x128xf32, #tpu.memory_space<vmem>>, %arg7: memref<1x128xf32, #tpu.memory_space<vmem>>, %arg8: memref<128x128xbf16, #tpu.memory_space<vmem>>, %arg9: memref<1x128xf32, #tpu.memory_space<vmem>>, %arg10: memref<8x128xf32, #tpu.memory_space<vmem>>, %arg11: memref<8x128xf32, #tpu.memory_space<vmem>>) attributes {dimension_semantics = [#tpu.dimension_semantics<parallel>], iteration_bounds = array<i64: 1>, scalar_prefetch = 0 : i64, scratch_operands = 0 : i64, tpu.core_type = #tpu.core_type<tc>, window_params = [{transform_indices = @transform_0, window_bounds = array<i64: 8, 128>}, {pipeline_mode = #tpu.pipeline_mode<synchronous>, transform_indices = @transform_1, window_bounds = array<i64: 128, 128>}, {pipeline_mode = #tpu.pipeline_mode<synchronous>, transform_indices = @transform_2, window_bounds = array<i64: 1, 128>}, {pipeline_mode = #tpu.pipeline_mode<synchronous>, transform_indices = @transform_3, window_bounds = array<i64: 1, 128>}, {pipeline_mode = #tpu.pipeline_mode<synchronous>, transform_indices = @transform_4, window_bounds = array<i64: 1, 128>}, {pipeline_mode = #tpu.pipeline_mode<synchronous>, transform_indices = @transform_5, window_bounds = array<i64: 1, 128>}, {pipeline_mode = #tpu.pipeline_mode<synchronous>, transform_indices = @transform_6, window_bounds = array<i64: 1, 128>}, {pipeline_mode = #tpu.pipeline_mode<synchronous>, transform_indices = @transform_7, window_bounds = array<i64: 128, 128>}, {pipeline_mode = #tpu.pipeline_mode<synchronous>, transform_indices = @transform_8, window_bounds = array<i64: 1, 128>}, {transform_indices = @transform_9, window_bounds = array<i64: 8, 128>}, {transform_indices = @transform_10, window_bounds = array<i64: 8, 128>}]} {
    %c0 = arith.constant 0 : index
    %c0_0 = arith.constant 0 : index
    %0 = vector.load %arg1[%c0, %c0_0] : memref<8x128xbf16, #tpu.memory_space<vmem>>, vector<8x128xbf16>
    %c0_1 = arith.constant 0 : index
    %c0_2 = arith.constant 0 : index
    %1 = vector.load %arg2[%c0_1, %c0_2] : memref<128x128xbf16, #tpu.memory_space<vmem>>, vector<128x128xbf16>
    %cst = arith.constant dense<0.000000e+00> : vector<8x128xf32>
    %2 = tpu.matmul %0, %1, %cst {dimension_numbers = #tpu.dot_dimension_numbers<[1], [0], [0], [1], [0, 0, 1, 1], [], []>} : vector<8x128xbf16>, vector<128x128xbf16>, vector<8x128xf32> -> vector<8x128xf32>
    %c0_3 = arith.constant 0 : index
    %c0_4 = arith.constant 0 : index
    %3 = vector.load %arg7[%c0_3, %c0_4] : memref<1x128xf32, #tpu.memory_space<vmem>>, vector<1x128xf32>
    %cst_5 = arith.constant 9.99999974E-6 : f32
    %4 = vector.broadcast %cst_5 : f32 to vector<1x128xf32>
    %5 = arith.addf %3, %4 : vector<1x128xf32>
    %6 = math.rsqrt %5 : vector<1x128xf32>
    %c0_6 = arith.constant 0 : index
    %c0_7 = arith.constant 0 : index
    %7 = vector.load %arg4[%c0_6, %c0_7] : memref<1x128xf32, #tpu.memory_space<vmem>>, vector<1x128xf32>
    %8 = arith.mulf %7, %6 : vector<1x128xf32>
    %c0_8 = arith.constant 0 : index
    %c0_9 = arith.constant 0 : index
    %9 = vector.load %arg3[%c0_8, %c0_9] : memref<1x128xf32, #tpu.memory_space<vmem>>, vector<1x128xf32>
    %c0_10 = arith.constant 0 : index
    %c0_11 = arith.constant 0 : index
    %10 = vector.load %arg6[%c0_10, %c0_11] : memref<1x128xf32, #tpu.memory_space<vmem>>, vector<1x128xf32>
    %11 = arith.subf %9, %10 : vector<1x128xf32>
    %12 = arith.mulf %11, %8 : vector<1x128xf32>
    %c0_12 = arith.constant 0 : index
    %c0_13 = arith.constant 0 : index
    %13 = vector.load %arg5[%c0_12, %c0_13] : memref<1x128xf32, #tpu.memory_space<vmem>>, vector<1x128xf32>
    %14 = arith.addf %12, %13 : vector<1x128xf32>
    %15 = vector.broadcast %8 : vector<1x128xf32> to vector<8x128xf32>
    %16 = arith.mulf %2, %15 : vector<8x128xf32>
    %17 = vector.broadcast %14 : vector<1x128xf32> to vector<8x128xf32>
    %18 = arith.addf %16, %17 : vector<8x128xf32>
    %c0_14 = arith.constant 0 : index
    %c0_15 = arith.constant 0 : index
    %19 = vector.load %arg11[%c0_14, %c0_15] : memref<8x128xf32, #tpu.memory_space<vmem>>, vector<8x128xf32>
    tpu.vector_store %arg11[%c0_14, %c0_15], %18 {strides = array<i32>} : memref<8x128xf32, #tpu.memory_space<vmem>>, vector<8x128xf32>,
    %20 = arith.truncf %18 : vector<8x128xf32> to vector<8x128xbf16>
    %c0_16 = arith.constant 0 : index
    %c0_17 = arith.constant 0 : index
    %21 = vector.load %arg8[%c0_16, %c0_17] : memref<128x128xbf16, #tpu.memory_space<vmem>>, vector<128x128xbf16>
    %cst_18 = arith.constant dense<0.000000e+00> : vector<8x128xf32>
    %22 = tpu.matmul %20, %21, %cst_18 {dimension_numbers = #tpu.dot_dimension_numbers<[1], [0], [0], [1], [0, 0, 1, 1], [], []>} : vector<8x128xbf16>, vector<128x128xbf16>, vector<8x128xf32> -> vector<8x128xf32>
    %c0_19 = arith.constant 0 : index
    %c0_20 = arith.constant 0 : index
    %23 = vector.load %arg9[%c0_19, %c0_20] : memref<1x128xf32, #tpu.memory_space<vmem>>, vector<1x128xf32>
    %24 = vector.broadcast %23 : vector<1x128xf32> to vector<8x128xf32>
    %25 = arith.addf %22, %24 : vector<8x128xf32>
    %c0_21 = arith.constant 0 : index
    %c0_22 = arith.constant 0 : index
    %26 = vector.load %arg10[%c0_21, %c0_22] : memref<8x128xf32, #tpu.memory_space<vmem>>, vector<8x128xf32>
    tpu.vector_store %arg10[%c0_21, %c0_22], %25 {strides = array<i32>} : memref<8x128xf32, #tpu.memory_space<vmem>>, vector<8x128xf32>,
    return
  }
  func.func @transform_0(%arg0: i32) -> (i32, i32) {
    %c0_i32 = arith.constant 0 : i32
    %c0_i32_0 = arith.constant 0 : i32
    return %arg0, %c0_i32 : i32, i32
  }
  func.func @transform_1(%arg0: i32) -> (i32, i32) {
    %c0_i32 = arith.constant 0 : i32
    %c0_i32_0 = arith.constant 0 : i32
    %c0_i32_1 = arith.constant 0 : i32
    return %c0_i32, %c0_i32_0 : i32, i32
  }
  func.func @transform_2(%arg0: i32) -> (i32, i32) {
    %c0_i32 = arith.constant 0 : i32
    %c0_i32_0 = arith.constant 0 : i32
    %c0_i32_1 = arith.constant 0 : i32
    return %c0_i32, %c0_i32_0 : i32, i32
  }
  func.func @transform_3(%arg0: i32) -> (i32, i32) {
    %c0_i32 = arith.constant 0 : i32
    %c0_i32_0 = arith.constant 0 : i32
    %c0_i32_1 = arith.constant 0 : i32
    return %c0_i32, %c0_i32_0 : i32, i32
  }
  func.func @transform_4(%arg0: i32) -> (i32, i32) {
    %c0_i32 = arith.constant 0 : i32
    %c0_i32_0 = arith.constant 0 : i32
    %c0_i32_1 = arith.constant 0 : i32
    return %c0_i32, %c0_i32_0 : i32, i32
  }
  func.func @transform_5(%arg0: i32) -> (i32, i32) {
    %c0_i32 = arith.constant 0 : i32
    %c0_i32_0 = arith.constant 0 : i32
    %c0_i32_1 = arith.constant 0 : i32
    return %c0_i32, %c0_i32_0 : i32, i32
  }
  func.func @transform_6(%arg0: i32) -> (i32, i32) {
    %c0_i32 = arith.constant 0 : i32
    %c0_i32_0 = arith.constant 0 : i32
    %c0_i32_1 = arith.constant 0 : i32
    return %c0_i32, %c0_i32_0 : i32, i32
  }
  func.func @transform_7(%arg0: i32) -> (i32, i32) {
    %c0_i32 = arith.constant 0 : i32
    %c0_i32_0 = arith.constant 0 : i32
    %c0_i32_1 = arith.constant 0 : i32
    return %c0_i32, %c0_i32_0 : i32, i32
  }
  func.func @transform_8(%arg0: i32) -> (i32, i32) {
    %c0_i32 = arith.constant 0 : i32
    %c0_i32_0 = arith.constant 0 : i32
    %c0_i32_1 = arith.constant 0 : i32
    return %c0_i32, %c0_i32_0 : i32, i32
  }
  func.func @transform_9(%arg0: i32) -> (i32, i32) {
    %c0_i32 = arith.constant 0 : i32
    %c0_i32_0 = arith.constant 0 : i32
    return %arg0, %c0_i32 : i32, i32
  }
  func.func @transform_10(%arg0: i32) -> (i32, i32) {
    %c0_i32 = arith.constant 0 : i32
    %c0_i32_0 = arith.constant 0 : i32
    return %arg0, %c0_i32 : i32, i32
  }
}

</mosaic_0001>

<bundles_post_ra>
// kernel: tpu_custom_call.1
= control target key start
LH: loop header
LB: loop body
LE: loop exit
PB: predicated region body
PF: predicated region fallthrough
CT: control target
= control target key end

     0   :  { %16 = vsyncpa [#allocation3], 0  ;;  %s718_s0 = inlined_call_operand.hbm [shape: bf16[8,128], index: 0, kind: input, shape index: {}]   ;;  %s719_s1 = inlined_call_operand.hbm [shape: bf16[128,128], index: 1, kind: input, shape index: {}]   ;;  %s720_s2 = inlined_call_operand.vmem [shape: f32[1,128], index: 2, kind: input, shape index: {}]   ;;  %s721_s3 = inlined_call_operand.vmem [shape: f32[1,128], index: 3, kind: input, shape index: {}]   ;;  %s722_s4 = inlined_call_operand.vmem [shape: f32[1,128], index: 4, kind: input, shape index: {}]   ;;  %s723_s5 = inlined_call_operand.vmem [shape: f32[1,128], index: 5, kind: input, shape index: {}]   ;;  %s724_s6 = inlined_call_operand.vmem [shape: f32[1,128], index: 6, kind: input, shape index: {}]   ;;  %s725_s7 = inlined_call_operand.hbm [shape: bf16[128,128], index: 7, kind: input, shape index: {}]   ;;  %s726_s8 = inlined_call_operand.vmem [shape: f32[1,128], index: 8, kind: input, shape index: {}]   ;;  %s727_s9 = inlined_call_operand.hbm [shape: f32[8,128], index: 9, kind: output, shape index: {0}]   ;;  %s728_s10 = inlined_call_operand.hbm [shape: f32[8,128], index: 10, kind: output, shape index: {1}]  }
   0x1   :  { %17 = vsyncpa [#allocation6], 0 }
   0x2   :  { %18 = vsyncpa [#allocation4], 0 }
   0x3   :  { %19 = vsyncpa [#allocation10], 0  ;;  %s570_s13 = smov [#allocation5]   ;;  %s452_s17 = scalar_lea.hbm %s719_s1, 1024 }
   0x4   :  { %s35_s14 = sshll.u32 %s570_s13, 4  ;;  %p453_p0 = scmp.ne.s32.totalorder %s719_s1, %s452_s17  ;;  %s36_s14 = int_to_ptr.vmem [resolvable:$true] %s35_s14 }
   0x5   :  { %p456_p1 = scmp.lt.u32.totalorder %s452_s17, %s719_s1 }
   0x7   :  { %p458_p2 = pnand %p456_p1, %p453_p0 }
   0x9   :  { %461 = shalt.err (!%p458_p2)
}
   0xa   :  { %s462_s22 = scalar_lea.vmem %s36_s14, 1024  ;;  %p467_p4 = scmp.lt.s32.totalorder %s36_s14, %s36_s14 }
   0xb   :  { %p463_p3 = scmp.ne.s32.totalorder %s36_s14, %s462_s22  ;;  %p468_p5 = scmp.lt.s32.totalorder %s462_s22, %s462_s22 }
   0xd   :  { %p469_p6 = por %p468_p5, %p467_p4 }
   0xf   :  { %p470_p7 = pnand %p469_p6, %p463_p3 }
  0x11   :  { %473 = shalt.err (!%p470_p7)
}
  0x12   :  { %s571_s23 = smov 64   ;;  %s572_s24 = smov 4  }
  0x13   :  { %41 = dma.hbm_to_vmem [thread:$0]  %s719_s1, 1024, %s36_s14, [#allocation6], %s571_s23, %s571_s23, %s572_s24  }
  0x14   :  { %s573_s27 = smov [#allocation2]   ;;  %s574_s29 = smov [#allocation7]  }
  0x15   :  { %s26_s28 = sshll.u32 %s573_s27, 4  ;;  %s57_s30 = sshll.u32 %s574_s29, 4  ;;  %s27_s28 = int_to_ptr.vmem [resolvable:$true] %s26_s28  ;;  %s58_s30 = int_to_ptr.vmem [resolvable:$true] %s57_s30 }
  0x16   :  { %s474_s13 = scalar_lea.hbm %s718_s0, 64 }
  0x17   :  { %p475_p8 = scmp.ne.s32.totalorder %s718_s0, %s474_s13  ;;  %p478_p9 = scmp.lt.u32.totalorder %s474_s13, %s718_s0 }
  0x19   :  { %p480_p10 = pnand %p478_p9, %p475_p8 }
  0x1b   :  { %483 = shalt.err (!%p480_p10)
}
  0x1c   :  { %s484_s1 = scalar_lea.vmem %s27_s28, 64  ;;  %p489_p12 = scmp.lt.s32.totalorder %s27_s28, %s27_s28 }
  0x1d   :  { %p485_p11 = scmp.ne.s32.totalorder %s27_s28, %s484_s1  ;;  %p490_p13 = scmp.lt.s32.totalorder %s484_s1, %s484_s1 }
  0x1f   :  { %p491_p0 = por %p490_p13, %p489_p12 }
  0x21   :  { %p492_p1 = pnand %p491_p0, %p485_p11 }
  0x23   :  { %495 = shalt.err (!%p492_p1)
}
  0x24   :  { %29 = dma.hbm_to_vmem [thread:$0]  %s718_s0, 64, %s27_s28, [#allocation3]  }
  0x25   :  { %s496_s22 = scalar_lea.hbm %s725_s7, 1024 }
  0x26   :  { %p497_p2 = scmp.ne.s32.totalorder %s725_s7, %s496_s22  ;;  %p500_p3 = scmp.lt.u32.totalorder %s496_s22, %s725_s7 }
  0x28   :  { %p502_p4 = pnand %p500_p3, %p497_p2 }
  0x2a   :  { %505 = shalt.err (!%p502_p4)
}
  0x2b   :  { %s506_s11 = scalar_lea.vmem %s58_s30, 1024  ;;  %p511_p6 = scmp.lt.s32.totalorder %s58_s30, %s58_s30 }
  0x2c   :  { %p507_p5 = scmp.ne.s32.totalorder %s58_s30, %s506_s11  ;;  %p512_p7 = scmp.lt.s32.totalorder %s506_s11, %s506_s11 }
  0x2e   :  { %p513_p8 = por %p512_p7, %p511_p6 }
  0x30   :  { %p514_p9 = pnand %p513_p8, %p507_p5 }
  0x32   :  { %517 = shalt.err (!%p514_p9)
}
  0x33   :  { %63 = dma.hbm_to_vmem [thread:$0]  %s725_s7, 1024, %s58_s30, [#allocation6], %s571_s23, %s571_s23, %s572_s24  }
  0x34   :  { %562 = dma.done.wait [#allocation3], 64  }
  0x35   :  { %563 = vsyncadd [#allocation3], 4294967232 }
  0x36   :  { %564 = dma.done.wait [#allocation6], 2048  }
  0x37   :  { %565 = vsyncadd [#allocation6], 4294965248  ;;  %v575_v0 = vmov 0.0   ;;  %vm576_vm0 = vmmov 0   ;;  %v434_v1 = vld [vmem:[#allocation5] sm:$0xff]   ;;  %v435_v2 = vld [vmem:[#allocation5 + $0x8] sm:$0xff]   ;;  %v193_v24 = vlaneseq }
  0x38   :  { %385 = vmatprep.subr.bf16.mxu0 %v575_v0  ;;  %401 = vmatprep.mubr.msk.bf16.mxu0 %vm576_vm0, %v575_v0  ;;  %v436_v3 = vld [vmem:[#allocation5 + $0x10] sm:$0xff]   ;;  %v442_v4 = vld [vmem:[#allocation7] sm:$0xff]   ;;  %v437_v5 = vld [vmem:[#allocation5 + $0x18] sm:$0xff]  }
  0x39   :  { %405 = vmatprep.subr.bf16.mxu1 %v575_v0  ;;  %421 = vmatprep.mubr.msk.bf16.mxu1 %vm576_vm0, %v575_v0  ;;  %v443_v6 = vld [vmem:[#allocation7 + $0x8] sm:$0xff]   ;;  %v438_v7 = vld [vmem:[#allocation5 + $0x20] sm:$0xff]   ;;  %v444_v8 = vld [vmem:[#allocation7 + $0x10] sm:$0xff]   ;;  %v194_v27 = vshrl.u32 %v193_v24, 7 }
  0x3a   :  { %386 = vmatpush3.bf16.msra.mxu0 %v434_v1  ;;  %406 = vmatpush3.bf16.msra.mxu1 %v442_v4  ;;  %v439_v9 = vld [vmem:[#allocation5 + $0x28] sm:$0xff]   ;;  %v445_v10 = vld [vmem:[#allocation7 + $0x18] sm:$0xff]   ;;  %v440_v11 = vld [vmem:[#allocation5 + $0x30] sm:$0xff]  }
  0x3b   :  { %387 = vmatprep.subr.bf16.mxu0 %v575_v0  ;;  %407 = vmatprep.subr.bf16.mxu1 %v575_v0  ;;  %v446_v12 = vld [vmem:[#allocation7 + $0x20] sm:$0xff]   ;;  %v441_v13 = vld [vmem:[#allocation5 + $0x38] sm:$0xff]   ;;  %v447_v14 = vld [vmem:[#allocation7 + $0x28] sm:$0xff]   ;;  %v195_v30 = vsub.s32 0, %v194_v27 }
  0x3c   :  { %v76_v15 = vld [vmem:[#allocation2] sm:$0xf]  ;;  %v448_v16 = vld [vmem:[#allocation7 + $0x30] sm:$0xff]  }
  0x3d   :  { %v449_v17 = vld [vmem:[#allocation7 + $0x38] sm:$0xff]  }
  0x3e   :  { %388 = vmatpush3.bf16.msra.mxu0 %v435_v2  ;;  %408 = vmatpush3.bf16.msra.mxu1 %v443_v6  ;;  %v181_v18 = vld [vmem:[%s724_s6] sm:$0x1] }
  0x3f   :  { %389 = vmatprep.subr.bf16.mxu0 %v575_v0  ;;  %409 = vmatprep.subr.bf16.mxu1 %v575_v0  ;;  %v182_v19 = vadd.f32 1e-05, %v181_v18  ;;  %v184_v21 = vld [vmem:[%s721_s3] sm:$0x1] }
  0x40   :  { %v186_v22 = vld [vmem:[%s720_s2] sm:$0x1]  ;;  %s577_s2 = smov [#allocation9]  }
  0x41   :  { %450 = vrsqrt.f32 %v182_v19  ;;  %v187_v23 = vld [vmem:[%s723_s5] sm:$0x1]  ;;  %s336_s3 = sshll.u32 %s577_s2, 4  ;;  %s337_s3 = int_to_ptr.vmem [resolvable:$true] %s336_s3 }
  0x42   :  { %390 = vmatpush3.bf16.msra.mxu0 %v436_v3  ;;  %410 = vmatpush3.bf16.msra.mxu1 %v444_v8  ;;  %v188_v26 = vsub.f32 %v186_v22, %v187_v23  ;;  %v190_v29 = vld [vmem:[%s722_s4] sm:$0x1]  ;;  %s518_s5 = scalar_lea.vmem %s337_s3, 128  ;;  %p523_p11 = scmp.lt.s32.totalorder %s337_s3, %s337_s3 }
  0x43   :  { %391 = vmatprep.subr.bf16.mxu0 %v575_v0  ;;  %411 = vmatprep.subr.bf16.mxu1 %v575_v0  ;;  %p519_p10 = scmp.ne.s32.totalorder %s337_s3, %s518_s5  ;;  %p524_p12 = scmp.lt.s32.totalorder %s518_s5, %s518_s5 }
  0x45   :  { %p525_p13 = por %p524_p12, %p523_p11 }
  0x46   :  { %392 = vmatpush3.bf16.msra.mxu0 %v437_v5  ;;  %412 = vmatpush3.bf16.msra.mxu1 %v445_v10 }
  0x47   :  { %393 = vmatprep.subr.bf16.mxu0 %v575_v0  ;;  %413 = vmatprep.subr.bf16.mxu1 %v575_v0  ;;  %p526_p0 = pnand %p525_p13, %p519_p10 }
  0x4a   :  { %394 = vmatpush3.bf16.msra.mxu0 %v438_v7  ;;  %414 = vmatpush3.bf16.msra.mxu1 %v446_v12 }
  0x4b   :  { %395 = vmatprep.subr.bf16.mxu0 %v575_v0  ;;  %415 = vmatprep.subr.bf16.mxu1 %v575_v0  ;;  %v451_v20 = vpop.eup %450 }
  0x4c   :  { %v185_v25 = vmul.f32 %v451_v20, %v184_v21 }
  0x4e   :  { %396 = vmatpush3.bf16.msra.mxu0 %v439_v9  ;;  %416 = vmatpush3.bf16.msra.mxu1 %v447_v14  ;;  %v189_v28 = vmul.f32 %v188_v26, %v185_v25  ;;  %v196_v32 = vrot.slane %v185_v25, %v195_v30 }
  0x4f   :  { %397 = vmatprep.subr.bf16.mxu0 %v575_v0  ;;  %417 = vmatprep.subr.bf16.mxu1 %v575_v0 }
  0x50   :  { %v191_v31 = vadd.f32 %v190_v29, %v189_v28 }
  0x52   :  { %398 = vmatpush3.bf16.msra.mxu0 %v440_v11  ;;  %418 = vmatpush3.bf16.msra.mxu1 %v448_v16  ;;  %v203_v33 = vrot.slane %v191_v31, %v195_v30 }
  0x53   :  { %399 = vmatprep.subr.bf16.mxu0 %v575_v0  ;;  %419 = vmatprep.subr.bf16.mxu1 %v575_v0 }
  0x56   :  { %400 = vmatpush3.bf16.msra.mxu0 %v441_v13  ;;  %420 = vmatpush3.bf16.msra.mxu1 %v449_v17 }
  0x59   :  { %402 = vmatmul.mubr.bf16.vlgmr.msra.gmra.mrb[0].mxu0 %v76_v15 }
 0x12c   :  { %v175_v34 = vpop.f32.mrb[0].mxu0 }
 0x12d   :  { %v198_v35 = vmul.f32 %v196_v32, %v175_v34  ;;  %v403_v36 = vpop.f32.mrb[1].mxu0 }
 0x12e   :  { %v178_v37 = vpop.f32.mrb[2].mxu0 }
 0x12f   :  { %v205_v38 = vadd.f32 %v203_v33, %v198_v35  ;;  %v404_v39 = vpop.f32.mrb[3].mxu0 }
 0x131   :  { %206 = vst [vmem:[#allocation9] sm:$0xff] %v205_v38  ;;  %v207_v40 = vpack.c.bf16 %v205_v38, %v205_v38 }
 0x133   :  { %422 = vmatmul.mubr.bf16.vlgmr.msra.gmra.mrb[0].mxu1 %v207_v40 }
 0x134   :  { %529 = shalt.err (!%p526_p0)
}
 0x135   :  { %s530_s1 = scalar_lea.hbm %s728_s10, 128 }
 0x136   :  { %p531_p1 = scmp.ne.s32.totalorder %s728_s10, %s530_s1  ;;  %p534_p2 = scmp.lt.u32.totalorder %s530_s1, %s728_s10 }
 0x138   :  { %p536_p3 = pnand %p534_p2, %p531_p1 }
 0x13a   :  { %539 = shalt.err (!%p536_p3)
}
 0x13b   :  { %339 = dma.vmem_to_hbm [thread:$0]  %s337_s3, 128, %s728_s10, [#allocation10]   ;;  %v358_v41 = vld [vmem:[%s726_s8] ss:$0 sm:$0xff] }
 0x13c   :  { %s578_s29 = smov [#allocation8]  }
 0x13d   :  { %s326_s11 = sshll.u32 %s578_s29, 4  ;;  %s327_s11 = int_to_ptr.vmem [resolvable:$true] %s326_s11 }
 0x13e   :  { %s540_s0 = scalar_lea.vmem %s327_s11, 128  ;;  %p545_p5 = scmp.lt.s32.totalorder %s327_s11, %s327_s11 }
 0x13f   :  { %p541_p4 = scmp.ne.s32.totalorder %s327_s11, %s540_s0  ;;  %p546_p6 = scmp.lt.s32.totalorder %s540_s0, %s540_s0 }
 0x141   :  { %p547_p7 = por %p546_p6, %p545_p5 }
 0x143   :  { %p548_p8 = pnand %p547_p7, %p541_p4 }
 0x206   :  { %v313_v42 = vpop.f32.mrb[0].mxu1 }
 0x207   :  { %v314_v43 = vadd.f32 %v358_v41, %v313_v42  ;;  %v423_v44 = vpop.f32.mrb[1].mxu1 }
 0x208   :  { %v316_v45 = vpop.f32.mrb[2].mxu1 }
 0x209   :  { %319 = vst [vmem:[#allocation8] sm:$0xff] %v314_v43  ;;  %v424_v46 = vpop.f32.mrb[3].mxu1 }
 0x20a   :  { %551 = shalt.err (!%p548_p8)
}
 0x20b   :  { %s552_s8 = scalar_lea.hbm %s727_s9, 128 }
 0x20c   :  { %p553_p9 = scmp.ne.s32.totalorder %s727_s9, %s552_s8  ;;  %p556_p10 = scmp.lt.u32.totalorder %s552_s8, %s727_s9 }
 0x20e   :  { %p558_p11 = pnand %p556_p10, %p553_p9 }
 0x210   :  { %561 = shalt.err (!%p558_p11)
}
 0x211   :  { %329 = dma.vmem_to_hbm [thread:$0]  %s327_s11, 128, %s727_s9, [#allocation4]  }
 0x212   :  { %566 = dma.done.wait [#allocation4], 128  }
 0x213   :  { %567 = vsyncadd [#allocation4], 4294967168 }
 0x214   :  { %568 = dma.done.wait [#allocation10], 128  }
 0x215   :  { %569 = vsyncadd [#allocation10], 4294967168 }
 0x216   :  { %346 = vsyncpa [#allocation3], 1 }
 0x217   :  { %347 = vsyncpa [#allocation6], 1 }
 0x218   :  { %348 = vsyncpa [#allocation4], 1 }
 0x219   :  { %349 = vsyncpa [#allocation10], 1 }

</bundles_post_ra>
